<compile_context>
chip_gen: v7x
topology: tpu7x:2x2x1
jax: 0.10.0
libtpu: 0.0.40
codegen_flags: <defaults>
</compile_context>

<pallas_src>
import math
from functools import partial

import jax
import jax.numpy as jnp
from jax.experimental import pallas as pl
from jax.experimental.pallas import tpu as pltpu


def _round_up(x, m):
    return ((x + m - 1) // m) * m


def _vmem_limit(nbytes):
    # derived scoped-VMEM limit: what we need + headroom, clamped to sane bounds.
    return int(min(max(nbytes + (16 << 20), 32 << 20), 100 << 20))


# ----------------------------------------------------------------------------
# Kernel 1: fused Q|K|V linear projection (tiled MXU matmul, bf16 operands,
# f32 accumulator / bias / output)
# ----------------------------------------------------------------------------
def _qkv_kernel(x_ref, w_ref, b_ref, o_ref, acc_ref):
    @pl.when(pl.program_id(2) == 0)
    def _init():
        acc_ref[...] = jnp.zeros_like(acc_ref)

    acc_ref[...] += jnp.dot(x_ref[...], w_ref[...],
                            preferred_element_type=jnp.float32)

    @pl.when(pl.program_id(2) == pl.num_programs(2) - 1)
    def _store():
        o_ref[...] = (acc_ref[...] + b_ref[...]).astype(o_ref.dtype)


def qkv_projection(x, w, b):
    """x:[N,nin] @ w:[nin,M] + b:[M] -> [N,M]  (M = 3*natt)."""
    N, K = x.shape
    M = w.shape[1]
    # bf16 operands: second-minor block dims must be multiples of 16 (or full dim).
    tm = 256 if N > 256 else _round_up(N, 16)
    tn = 256 if M > 256 else _round_up(M, 128)
    tk = 512 if K > 512 else K
    Npad, Mpad, Kpad = _round_up(N, tm), _round_up(M, tn), _round_up(K, tk)

    xp = jnp.pad(x.astype(jnp.float32), ((0, Npad - N), (0, Kpad - K))).astype(jnp.bfloat16)
    wp = jnp.pad(w.astype(jnp.float32), ((0, Kpad - K), (0, Mpad - M))).astype(jnp.bfloat16)
    bp = jnp.pad(b.astype(jnp.float32).reshape(1, M), ((0, 0), (0, Mpad - M)))

    vmem = _vmem_limit(2 * (tm * tk + tk * tn) * 2          # bf16 input blocks (x2 buffers)
                       + 2 * tm * tn * 4 + tm * tn * 4)     # out blocks + f32 accumulator
    out = pl.pallas_call(
        _qkv_kernel,
        out_shape=jax.ShapeDtypeStruct((Npad, Mpad), jnp.float32),
        grid=(Npad // tm, Mpad // tn, Kpad // tk),
        in_specs=[
            pl.BlockSpec((tm, tk), lambda i, j, k: (i, k)),
            pl.BlockSpec((tk, tn), lambda i, j, k: (k, j)),
            pl.BlockSpec((1, tn), lambda i, j, k: (0, j)),
        ],
        out_specs=pl.BlockSpec((tm, tn), lambda i, j, k: (i, j)),
        scratch_shapes=[pltpu.VMEM((tm, tn), jnp.float32)],
        compiler_params=pltpu.CompilerParams(
            dimension_semantics=("parallel", "parallel", "arbitrary"),
            vmem_limit_bytes=vmem,
        ),
    )(xp, wp, bp)
    return out[:N, :M]


# ----------------------------------------------------------------------------
# Kernel 2 / pass A: fused edge gather + scaled-dot scores + ONLINE segment
# softmax statistics.  Single sweep over edge tiles; nmax/nden accumulate in
# resident output blocks (constant index map), prods written once per tile.
# ----------------------------------------------------------------------------
def _edge_scores_kernel(src_ref, dst_ref, segc_ref, ew_ref, qT_ref, kT_ref,
                        prods_ref, nmax_ref, nden_ref,
                        *, nhead, dpad, inv_sqrt_dk, norm_on_src):
    e = pl.program_id(0)
    H, Dp = nhead, dpad
    Np = qT_ref.shape[1]
    Et = src_ref.shape[1]
    neg_big = jnp.float32(-1e30)

    @pl.when(e == 0)
    def _init():
        nmax_ref[...] = jnp.full(nmax_ref.shape, neg_big, jnp.float32)
        nden_ref[...] = jnp.zeros(nden_ref.shape, jnp.float32)

    node_col = jax.lax.broadcasted_iota(jnp.int32, (Np, 1), 0)   # [Np,1]
    node_row = jax.lax.broadcasted_iota(jnp.int32, (1, Np), 1)   # [1,Np]

    # Exact 0/1 one-hots; padded edges (id = Np, out of range) give all-zero
    # columns/rows so they never touch the accumulators.
    ohN_src = (node_col == src_ref[...]).astype(jnp.float32)     # [Np,Et]
    ohN_dst = (node_col == dst_ref[...]).astype(jnp.float32)     # [Np,Et]
    ohN_seg = ohN_src if norm_on_src else ohN_dst                # [Np,Et]
    ohE_seg = (segc_ref[...] == node_row).astype(jnp.float32)    # [Et,Np]

    # Fused gather q[edge0] / k[edge1] on the MXU; q/k stay resident in VMEM.
    # TODO(synk): bf16 one-hots + bf16 q/k would be a drop-in MXU speedup but
    # breaks the 1e-5 parity check against the f32 reference.
    q_src = jnp.dot(qT_ref[...], ohN_src, preferred_element_type=jnp.float32)  # [H*Dp,Et]
    k_dst = jnp.dot(kT_ref[...], ohN_dst, preferred_element_type=jnp.float32)  # [H*Dp,Et]
    qk = q_src * k_dst

    # Per-head d_k reduction over 8-aligned sublane groups (heads padded to Dp).
    prods = jnp.concatenate(
        [jnp.sum(qk[h * Dp:(h + 1) * Dp, :], axis=0, keepdims=True)
         for h in range(H)], axis=0)                                            # [H,Et]
    prods = prods * (ew_ref[...] * jnp.float32(inv_sqrt_dk))
    prods_ref[...] = prods          # lane-dense [H, Et] store, written exactly once

    # --- online segment-softmax statistics -----------------------------------
    # Stabilizer = running max of per-tile maxima for nodes present in the tile
    # (upper bound of the true segment max; pass B applies the same shift to
    # numerator and denominator, so the result is mathematically exact).
    tile_max = jnp.max(prods, axis=1, keepdims=True)                            # [H,1]
    counts = jnp.dot(jnp.ones((1, Et), jnp.float32), ohE_seg,
                     preferred_element_type=jnp.float32)                        # [1,Np]
    seen = counts > 0.0
    old_max = nmax_ref[...]
    new_max = jnp.where(seen, jnp.maximum(old_max, tile_max), old_max)          # [H,Np]
    max_g = jnp.dot(new_max, ohN_seg, preferred_element_type=jnp.float32)       # [H,Et]
    contrib = jnp.dot(jnp.exp(prods - max_g), ohE_seg,
                      preferred_element_type=jnp.float32)                       # [H,Np]
    nden_ref[...] = nden_ref[...] * jnp.exp(old_max - new_max) + contrib
    nmax_ref[...] = new_max


# ----------------------------------------------------------------------------
# Kernel 2 / pass B: normalize.  Re-reads prods + nmax/nden, gathers the
# per-edge shift/denominator via a one-hot MXU matmul, emits attention.
# Fully parallel over edge tiles.
# ----------------------------------------------------------------------------
def _edge_norm_kernel(segr_ref, prods_ref, nmax_ref, nden_ref, att_ref):
    Np = nmax_ref.shape[1]
    node_col = jax.lax.broadcasted_iota(jnp.int32, (Np, 1), 0)                  # [Np,1]
    ohN_seg = (node_col == segr_ref[...]).astype(jnp.float32)                   # [Np,Et]
    max_g = jnp.dot(nmax_ref[...], ohN_seg, preferred_element_type=jnp.float32)  # [H,Et]
    den_g = jnp.dot(nden_ref[...], ohN_seg, preferred_element_type=jnp.float32)  # [H,Et]
    att_ref[...] = jnp.exp(prods_ref[...] - max_g) / (den_g + jnp.float32(1e-16))


def _resident_spec(shape, single_buffer):
    """Constant-index (VMEM-resident) BlockSpec, optionally single-buffered."""
    idx = lambda *_: (0,) * len(shape)
    if single_buffer:
        return pl.BlockSpec(shape, idx, pipeline_mode=pl.Buffered(1))
    return pl.BlockSpec(shape, idx)


def _edge_attention_calls(src_row, dst_row, seg_col, seg_row, ew_row, qT, kT,
                          *, nhead, dpad, d_k, Np, Et, Ep, norm_on_src,
                          single_buffer_resident):
    HDp = nhead * dpad
    n_tiles = Ep // Et
    rbuf = 1 if single_buffer_resident else 2

    vmem_a = _vmem_limit(
        rbuf * 2 * HDp * Np * 4                  # resident q^T / k^T
        + 2 * 2 * nhead * Np * 4                 # nmax / nden output blocks
        + 2 * nhead * Et * 4                     # prods output blocks
        + 4 * Np * Et * 4 + 4 * HDp * Et * 4)    # one-hot / gather temporaries

    score_kernel = partial(_edge_scores_kernel, nhead=nhead, dpad=dpad,
                           inv_sqrt_dk=1.0 / math.sqrt(d_k),
                           norm_on_src=norm_on_src)
    prods_T, nmax, nden = pl.pallas_call(
        score_kernel,
        out_shape=(jax.ShapeDtypeStruct((nhead, Ep), jnp.float32),
                   jax.ShapeDtypeStruct((nhead, Np), jnp.float32),
                   jax.ShapeDtypeStruct((nhead, Np), jnp.float32)),
        grid=(n_tiles,),
        in_specs=[
            pl.BlockSpec((1, Et), lambda e: (0, e)),              # src ids (row)
            pl.BlockSpec((1, Et), lambda e: (0, e)),              # dst ids (row)
            pl.BlockSpec((Et, 1), lambda e: (e, 0)),              # seg ids (column)
            pl.BlockSpec((1, Et), lambda e: (0, e)),              # edge weights
            _resident_spec((HDp, Np), single_buffer_resident),    # q^T (resident)
            _resident_spec((HDp, Np), single_buffer_resident),    # k^T (resident)
        ],
        out_specs=(
            pl.BlockSpec((nhead, Et), lambda e: (0, e)),          # prods  [H, E]
            pl.BlockSpec((nhead, Np), lambda e: (0, 0)),          # running max (acc)
            pl.BlockSpec((nhead, Np), lambda e: (0, 0)),          # running denom (acc)
        ),
        compiler_params=pltpu.CompilerParams(
            # online accumulation across edge tiles -> sequential.
            # TODO(synk): per-core partial accumulators would expose a parallel
            # axis for v7x's 2 TensorCores in this pass as well.
            dimension_semantics=("arbitrary",),
            vmem_limit_bytes=vmem_a,
        ),
    )(src_row, dst_row, seg_col, ew_row, qT, kT)

    vmem_b = _vmem_limit(
        rbuf * 2 * nhead * Np * 4
        + 4 * nhead * Et * 4 + 2 * Np * Et * 4)
    att_T = pl.pallas_call(
        _edge_norm_kernel,
        out_shape=jax.ShapeDtypeStruct((nhead, Ep), jnp.float32),
        grid=(n_tiles,),
        in_specs=[
            pl.BlockSpec((1, Et), lambda e: (0, e)),              # seg ids (row)
            pl.BlockSpec((nhead, Et), lambda e: (0, e)),          # prods
            _resident_spec((nhead, Np), single_buffer_resident),  # nmax (resident)
            _resident_spec((nhead, Np), single_buffer_resident),  # nden (resident)
        ],
        out_specs=pl.BlockSpec((nhead, Et), lambda e: (0, e)),
        compiler_params=pltpu.CompilerParams(
            dimension_semantics=("parallel",),                    # 2 TCs on v7x
            vmem_limit_bytes=vmem_b,
        ),
    )(seg_row, prods_T, nmax, nden)
    return prods_T, att_T


def edge_attention(q, k, edge, edge_weights, nhead, d_k,
                   attention_norm_idx=0, edge_tile=512):
    """Returns (attention [E,nhead], prods [E,nhead])."""
    N, HD = q.shape
    assert HD == nhead * d_k
    E = edge.shape[1]

    Np = _round_up(N, 128)                       # nodes on the 128-lane axis in-kernel
    dpad = _round_up(d_k, 8)                     # pad each head to a full sublane group
    HDp = nhead * dpad

    # Edge tile: as large as possible (fewer grid steps, lane-dense stores) but
    # keep the [Np, Et] one-hot temporaries within a ~40 MiB budget.
    Et = min(edge_tile, _round_up(E, 128))
    cap = max(128, ((40 << 20) // (16 * Np)) // 128 * 128)
    Et = max(128, min(_round_up(Et, 128), cap))
    Ep = _round_up(E, Et)

    def to_head_T(a):                            # [N, H*d_k] -> [H*dpad, Np]
        a3 = a.reshape(N, nhead, d_k)
        if dpad != d_k:
            a3 = jnp.pad(a3, ((0, 0), (0, 0), (0, dpad - d_k)))
        aT = a3.transpose(1, 2, 0).reshape(HDp, N)
        return jnp.pad(aT, ((0, 0), (0, Np - N)))
    # TODO(synk): emit q/k already transposed+head-padded from the QKV kernel
    # to save this XLA transpose round trip.
    qT = to_head_T(q.astype(jnp.float32))
    kT = to_head_T(k.astype(jnp.float32))

    def pad_idx(v):                              # padded edges -> out-of-range id (=Np)
        return jnp.pad(v.astype(jnp.int32), (0, Ep - E), constant_values=Np)

    src = pad_idx(edge[0])
    dst = pad_idx(edge[1])
    seg = src if attention_norm_idx == 0 else dst
    src_row = src.reshape(1, Ep)
    dst_row = dst.reshape(1, Ep)
    seg_row = seg.reshape(1, Ep)
    seg_col = seg.reshape(Ep, 1)

    if edge_weights is None:
        ew_row = jnp.ones((1, Ep), jnp.float32)
    else:
        ew_row = jnp.pad(edge_weights.astype(jnp.float32), (0, Ep - E),
                         constant_values=1.0).reshape(1, Ep)

    kwargs = dict(nhead=nhead, dpad=dpad, d_k=d_k, Np=Np, Et=Et, Ep=Ep,
                  norm_on_src=(attention_norm_idx == 0))
    try:
        # Single-buffer the constant-index resident blocks (halves their VMEM
        # footprint; relevant for v7x's 64 MiB VMEM).
        prods_T, att_T = _edge_attention_calls(
            src_row, dst_row, seg_col, seg_row, ew_row, qT, kT,
            single_buffer_resident=True, **kwargs)
    except Exception:
        # pipeline_mode=pl.Buffered(1) unsupported by this build -> default buffering.
        prods_T, att_T = _edge_attention_calls(
            src_row, dst_row, seg_col, seg_row, ew_row, qT, kT,
            single_buffer_resident=False, **kwargs)

    # lane-dense [H, E] -> module layout [E, H] (cheap XLA glue)
    return att_T[:, :E].T, prods_T[:, :E].T


# ----------------------------------------------------------------------------
# Module wrapper (parameter setup + glue)
# ----------------------------------------------------------------------------
class SpGraphTransAttention:
    """Pallas-TPU forward of the torch module (attention_type='scaled_dot',
    square_plus=False).  Wout / Sigmoid exist in the torch module but are never
    used in forward, so they are omitted here."""
    # TODO(synk): only the repo-default scaled_dot + softmax path is implemented;
    # the 'cosine_sim'/'pearson' attention types and square_plus are not.

    def __init__(self, nin, natt, nhead, key, edge_weights=None,
                 attention_norm_idx=0):
        assert natt % nhead == 0
        self.nin, self.natt, self.nhead = nin, natt, nhead
        self.d_k = natt // nhead
        self.attention_norm_idx = attention_norm_idx
        self.edge_weights = edge_weights
        kq, kk, kv = jax.random.split(key, 3)
        bound = 1.0 / math.sqrt(nin)
        # torch init_weights: weights constant 1e-5; biases keep nn.Linear's
        # default U(-1/sqrt(nin), 1/sqrt(nin)).
        self.Wq = jnp.full((nin, natt), 1e-5, jnp.float32)
        self.Wk = jnp.full((nin, natt), 1e-5, jnp.float32)
        self.Wv = jnp.full((nin, natt), 1e-5, jnp.float32)
        self.bq = jax.random.uniform(kq, (natt,), jnp.float32, -bound, bound)
        self.bk = jax.random.uniform(kk, (natt,), jnp.float32, -bound, bound)
        self.bv = jax.random.uniform(kv, (natt,), jnp.float32, -bound, bound)

    def __call__(self, x, edge):
        N = x.shape[0]
        H, D = self.nhead, self.d_k
        w_qkv = jnp.concatenate([self.Wq, self.Wk, self.Wv], axis=1)   # [nin, 3*natt]
        b_qkv = jnp.concatenate([self.bq, self.bk, self.bv])           # [3*natt]
        qkv = qkv_projection(x, w_qkv, b_qkv)                          # Pallas MXU
        q, k, v = jnp.split(qkv, 3, axis=1)                            # each [N, natt]
        attention, prods = edge_attention(
            q, k, edge, self.edge_weights, H, D,
            attention_norm_idx=self.attention_norm_idx)                # Pallas fused
        v_out = v.reshape(N, H, D).transpose(0, 2, 1)                  # [N, d_k, nhead]
        return attention, (v_out, prods)


# ----------------------------------------------------------------------------
# Pure-JAX reference (correctness check only)
# ----------------------------------------------------------------------------
def reference_forward(m, x, edge):
    N = x.shape[0]
    H, D = m.nhead, m.d_k
    q = x @ m.Wq + m.bq
    k = x @ m.Wk + m.bk
    v = x @ m.Wv + m.bv
    src = q.reshape(N, H, D)[edge[0]]
    dst = k.reshape(N, H, D)[edge[1]]
    prods = jnp.sum(src * dst, axis=-1) / jnp.float32(math.sqrt(D))    # [E, H]
    if m.edge_weights is not None:
        prods = prods * m.edge_weights[:, None]
    idx = edge[m.attention_norm_idx]
    seg_max = jax.ops.segment_max(prods, idx, num_segments=N)
    shifted = jnp.exp(prods - seg_max[idx])
    denom = jax.ops.segment_sum(shifted, idx, num_segments=N)[idx]
    att = shifted / (denom + 1e-16)
    v_out = v.reshape(N, H, D).transpose(0, 2, 1)
    return att, (v_out, prods)


if __name__ == "__main__":
    key = jax.random.PRNGKey(0)
    k_x, k_e, k_p = jax.random.split(key, 3)

    N, nin, natt, nhead, E = 16, 8, 16, 4, 32
    x = jax.random.normal(k_x, (N, nin), jnp.float32)
    edge = jax.random.randint(k_e, (2, E), 0, N, dtype=jnp.int32)

    module = SpGraphTransAttention(nin, natt, nhead, key=k_p)
    att, (v_out, prods) = module(x, edge)
    jax.block_until_ready((att, v_out, prods))

    ref_att, (ref_v, ref_prods) = reference_forward(module, x, edge)
    assert att.shape == (E, nhead)
    assert prods.shape == (E, nhead)
    assert v_out.shape == (N, natt // nhead, nhead)
    assert jnp.allclose(prods, ref_prods, atol=1e-5, rtol=1e-5)
    assert jnp.allclose(att, ref_att, atol=1e-5, rtol=1e-5)
    assert jnp.allclose(v_out, ref_v, atol=1e-5, rtol=1e-5)

    print("KERNEL_OK")
</pallas_src>

<mosaic_0001>
module attributes {stable_mosaic.version = 11 : i64} {
  func.func @_qkv_kernel(%arg0: i32, %arg1: i32, %arg2: i32, %arg3: memref<16x8xbf16, #tpu.memory_space<vmem>>, %arg4: memref<8x128xbf16, #tpu.memory_space<vmem>>, %arg5: memref<1x128xf32, #tpu.memory_space<vmem>>, %arg6: memref<16x128xf32, #tpu.memory_space<vmem>>, %arg7: memref<16x128xf32, #tpu.memory_space<vmem>>) attributes {dimension_semantics = [#tpu.dimension_semantics<parallel>, #tpu.dimension_semantics<parallel>, #tpu.dimension_semantics<arbitrary>], iteration_bounds = array<i64: 1, 1, 1>, scalar_prefetch = 0 : i64, scratch_operands = 1 : i64, tpu.core_type = #tpu.core_type<tc>, window_params = [{transform_indices = @transform_0, window_bounds = array<i64: 16, 8>}, {transform_indices = @transform_1, window_bounds = array<i64: 8, 128>}, {transform_indices = @transform_2, window_bounds = array<i64: 1, 128>}, {transform_indices = @transform_3, window_bounds = array<i64: 16, 128>}]} {
    %c0_i32 = arith.constant 0 : i32
    %0 = arith.cmpi eq, %arg2, %c0_i32 : i32
    %1 = arith.extui %0 : i1 to i32
    %c0_i32_0 = arith.constant 0 : i32
    %2 = arith.cmpi ne, %1, %c0_i32_0 : i32
    scf.if %2 {
      %cst_10 = arith.constant 0.000000e+00 : f32
      %12 = vector.broadcast %cst_10 : f32 to vector<16x128xf32>
      %c0_11 = arith.constant 0 : index
      %c0_12 = arith.constant 0 : index
      %13 = vector.load %arg7[%c0_11, %c0_12] : memref<16x128xf32, #tpu.memory_space<vmem>>, vector<16x128xf32>
      tpu.vector_store %arg7[%c0_11, %c0_12], %12 {strides = array<i32>} : memref<16x128xf32, #tpu.memory_space<vmem>>, vector<16x128xf32>,
    } else {
    }
    %c0 = arith.constant 0 : index
    %c0_1 = arith.constant 0 : index
    %3 = vector.load %arg7[%c0, %c0_1] : memref<16x128xf32, #tpu.memory_space<vmem>>, vector<16x128xf32>
    %c0_2 = arith.constant 0 : index
    %c0_3 = arith.constant 0 : index
    %4 = vector.load %arg3[%c0_2, %c0_3] : memref<16x8xbf16, #tpu.memory_space<vmem>>, vector<16x8xbf16>
    %c0_4 = arith.constant 0 : index
    %c0_5 = arith.constant 0 : index
    %5 = vector.load %arg4[%c0_4, %c0_5] : memref<8x128xbf16, #tpu.memory_space<vmem>>, vector<8x128xbf16>
    %cst = arith.constant dense<0.000000e+00> : vector<16x128xf32>
    %6 = tpu.matmul %4, %5, %cst {dimension_numbers = #tpu.dot_dimension_numbers<[1], [0], [0], [1], [0, 0, 1, 1], [], []>} : vector<16x8xbf16>, vector<8x128xbf16>, vector<16x128xf32> -> vector<16x128xf32>
    %7 = arith.addf %3, %6 : vector<16x128xf32>
    %c0_6 = arith.constant 0 : index
    %c0_7 = arith.constant 0 : index
    %8 = vector.load %arg7[%c0_6, %c0_7] : memref<16x128xf32, #tpu.memory_space<vmem>>, vector<16x128xf32>
    tpu.vector_store %arg7[%c0_6, %c0_7], %7 {strides = array<i32>} : memref<16x128xf32, #tpu.memory_space<vmem>>, vector<16x128xf32>,
    %c0_i32_8 = arith.constant 0 : i32
    %9 = arith.cmpi eq, %arg2, %c0_i32_8 : i32
    %10 = arith.extui %9 : i1 to i32
    %c0_i32_9 = arith.constant 0 : i32
    %11 = arith.cmpi ne, %10, %c0_i32_9 : i32
    scf.if %11 {
      %c0_10 = arith.constant 0 : index
      %c0_11 = arith.constant 0 : index
      %12 = vector.load %arg7[%c0_10, %c0_11] : memref<16x128xf32, #tpu.memory_space<vmem>>, vector<16x128xf32>
      %c0_12 = arith.constant 0 : index
      %c0_13 = arith.constant 0 : index
      %13 = vector.load %arg5[%c0_12, %c0_13] : memref<1x128xf32, #tpu.memory_space<vmem>>, vector<1x128xf32>
      %14 = vector.broadcast %13 : vector<1x128xf32> to vector<16x128xf32>
      %15 = arith.addf %12, %14 : vector<16x128xf32>
      %c0_14 = arith.constant 0 : index
      %c0_15 = arith.constant 0 : index
      %16 = vector.load %arg6[%c0_14, %c0_15] : memref<16x128xf32, #tpu.memory_space<vmem>>, vector<16x128xf32>
      tpu.vector_store %arg6[%c0_14, %c0_15], %15 {strides = array<i32>} : memref<16x128xf32, #tpu.memory_space<vmem>>, vector<16x128xf32>,
    } else {
    }
    return
  }
  func.func @transform_0(%arg0: i32, %arg1: i32, %arg2: i32) -> (i32, i32) {
    %c0_i32 = arith.constant 0 : i32
    return %arg0, %arg2 : i32, i32
  }
  func.func @transform_1(%arg0: i32, %arg1: i32, %arg2: i32) -> (i32, i32) {
    %c0_i32 = arith.constant 0 : i32
    return %arg2, %arg1 : i32, i32
  }
  func.func @transform_2(%arg0: i32, %arg1: i32, %arg2: i32) -> (i32, i32) {
    %c0_i32 = arith.constant 0 : i32
    %c0_i32_0 = arith.constant 0 : i32
    return %c0_i32, %arg1 : i32, i32
  }
  func.func @transform_3(%arg0: i32, %arg1: i32, %arg2: i32) -> (i32, i32) {
    %c0_i32 = arith.constant 0 : i32
    return %arg0, %arg1 : i32, i32
  }
}

</mosaic_0001>

<bundles_post_ra>
// kernel: tpu_custom_call.1
= control target key start
LH: loop header
LB: loop body
LE: loop exit
PB: predicated region body
PF: predicated region fallthrough
CT: control target
= control target key end

     0   :  { %vm36_vm0 = vcmask 1043456   ;;  %v158_v1 = vmov 0.0   ;;  %vm159_vm1 = vmmov 0   ;;  %vm32_vm2 = vcmask 64512   ;;  %s204_s0 = inlined_call_operand.vmem [shape: bf16[16,8], index: 0, kind: input, shape index: {}]   ;;  %s205_s1 = inlined_call_operand.vmem [shape: bf16[8,128], index: 1, kind: input, shape index: {}]   ;;  %s206_s2 = inlined_call_operand.vmem [shape: f32[1,128], index: 2, kind: input, shape index: {}]   ;;  %s207_s3 = inlined_call_operand.hbm [shape: f32[16,128], index: 3, kind: output, shape index: {}]  }
   0x1   :  { %v26_v0 = vld [vmem:[%s205_s1] sm:$0xf]  ;;  %122 = vmatprep.subr.bf16.mxu0 %v158_v1  ;;  %124 = vmatprep.mubr.msk.bf16.mxu0 %vm159_vm1, %v158_v1 }
   0x2   :  { %v38_v2 = vsel %vm36_vm0, %v26_v0, 0  ;;  %v133_v3 = vld [vmem:[%s204_s0] sm:$0xff]  }
   0x3   :  { %123 = vmatpush3.bf16.msra.mxu0 %v38_v2 }
   0x4   :  { %8 = vsyncpa [#allocation4], 0  ;;  %v119_v4 = vld [vmem:[%s206_s2] ss:$0 sm:$0xff]  ;;  %s160_s18 = smov [#allocation3]  }
   0x5   :  { %s106_s1 = sshll.u32 %s160_s18, 4  ;;  %s107_s1 = int_to_ptr.vmem [resolvable:$true] %s106_s1 }
   0x6   :  { %125 = vmatmul.mubr.msk.bf16.vlgmr.msra.gmra.mrb[0].mxu0 %vm32_vm2, %v133_v3  ;;  %s134_s0 = scalar_lea.vmem %s107_s1, 256  ;;  %p139_p1 = scmp.lt.s32.totalorder %s107_s1, %s107_s1 }
   0x7   :  { %p135_p0 = scmp.ne.s32.totalorder %s107_s1, %s134_s0  ;;  %p140_p2 = scmp.lt.s32.totalorder %s134_s0, %s134_s0 }
   0x9   :  { %p141_p3 = por %p140_p2, %p139_p1 }
   0xb   :  { %p142_p4 = pnand %p141_p3, %p135_p0 }
  0xd9   :  { %v74_v5 = vpop.f32.mrb[0].mxu0 }
  0xda   :  { %v97_v6 = vadd.f32 %v119_v4, %v74_v5  ;;  %v126_v7 = vpop.f32.mrb[1].mxu0 }
  0xdb   :  { %v77_v8 = vpop.f32.mrb[2].mxu0 }
  0xdc   :  { %99 = vst [vmem:[#allocation3] sm:$0xff] %v97_v6  ;;  %v98_v9 = vadd.f32 %v119_v4, %v77_v8  ;;  %v127_v10 = vpop.f32.mrb[3].mxu0 }
  0xde   :  { %100 = vst [vmem:[#allocation3 + $0x8] sm:$0xff] %v98_v9 }
  0xdf   :  { %145 = shalt.err (!%p142_p4)
}
  0xe0   :  { %s146_s20 = scalar_lea.hbm %s207_s3, 256 }
  0xe1   :  { %p147_p5 = scmp.ne.s32.totalorder %s207_s3, %s146_s20  ;;  %p150_p6 = scmp.lt.u32.totalorder %s146_s20, %s207_s3 }
  0xe3   :  { %p152_p7 = pnand %p150_p6, %p147_p5 }
  0xe5   :  { %155 = shalt.err (!%p152_p7)
}
  0xe6   :  { %s161_s25 = smov 128   ;;  %s162_s26 = smov 8  }
  0xe7   :  { %112 = dma.vmem_to_hbm [thread:$0]  %s107_s1, 256, %s207_s3, [#allocation4], %s161_s25, %s161_s25, %s162_s26  }
  0xe8   :  { %156 = dma.done.wait [#allocation4], 256  }
  0xe9   :  { %157 = vsyncadd [#allocation4], 4294967040 }
  0xea   :  { %116 = vsyncpa [#allocation4], 1 }

</bundles_post_ra>
